<compile_context>
chip_gen: v7x
topology: tpu7x:2x2x1
jax: 0.10.0
libtpu: 0.0.40
codegen_flags: <defaults>
</compile_context>

<pallas_src>
import functools

import jax
import jax.numpy as jnp
import numpy as np
from jax.experimental import pallas as pl
from jax.experimental.pallas import tpu as pltpu


# ----------------------------- Pallas kernel --------------------------------
def _wide_and_deep_kernel(
    x_wide_ref,   # [TB, n_wide]        f32 (or bf16, cast in-kernel)
    x_deep_ref,   # [TB, LG + 3]        int8/int16/int32 (genres + gender/age/occ ids)
    w1g_ref,      # [H1, LG]            f32  Linear_1^T rows for genres
    w1c_ref,      # [H1, n_g+n_a+n_o]   f32  Linear_1^T with embedding tables folded in
    b1_ref,       # [H1, 1]             f32
    w2_ref,       # [H2, H1]            f32
    b2_ref,       # [H2, 1]             f32
    w3_ref,       # [H3, H2]            f32
    b3_ref,       # [H3, 1]             f32
    wfw_ref,      # [1, n_wide]         f32  final Linear, wide slice
    wfd_ref,      # [1, H3]             f32  final Linear, deep slice
    bf_ref,       # [1, 1]              f32
    out_ref,      # [1, TB]             f32  lane-dense sigmoid outputs
    *,
    len_genres, n_gender, n_age, n_occupation,
):
    f32 = jnp.float32
    lg = len_genres
    n_cat = n_gender + n_age + n_occupation

    xd = x_deep_ref[...].astype(jnp.int32)       # (TB, LG+3); int8->i32 is a cheap unpack
    tb = xd.shape[0]

    genres = xd[:, :lg].astype(f32)              # (TB, LG)  multi-hot genre bits

    # Fused one-hot over the concatenated [gender | age | occupation] vocabulary:
    # a single iota + cumulative-offset id compares (exact row select on the MXU).
    iota = jax.lax.broadcasted_iota(jnp.int32, (tb, n_cat), 1)
    gid = xd[:, lg + 0:lg + 1]
    aid = xd[:, lg + 1:lg + 2] + n_gender
    oid = xd[:, lg + 2:lg + 3] + (n_gender + n_age)
    onehot = ((iota == gid) | (iota == aid) | (iota == oid)).astype(f32)   # (TB, n_cat)

    # Weights-on-the-left (lane-dense) MLP:  A (H,K) x B (TB,K) contracted on K -> (H, TB)
    dn_bt = (((1,), (1,)), ((), ()))
    h = (jax.lax.dot_general(w1g_ref[...], genres, dn_bt, preferred_element_type=f32)
         + jax.lax.dot_general(w1c_ref[...], onehot, dn_bt, preferred_element_type=f32)
         + b1_ref[...])
    h = jnp.maximum(h, 0.0)                                                # (H1, TB)

    h = jnp.maximum(jnp.dot(w2_ref[...], h, preferred_element_type=f32) + b2_ref[...], 0.0)  # (H2, TB)
    h = jnp.maximum(jnp.dot(w3_ref[...], h, preferred_element_type=f32) + b3_ref[...], 0.0)  # (H3, TB)

    # Final wide+deep Linear, emitted lane-dense as a (1, TB) row (no concat needed).
    xw = x_wide_ref[...].astype(f32)
    logit = (jax.lax.dot_general(wfw_ref[...], xw, dn_bt, preferred_element_type=f32)
             + jnp.dot(wfd_ref[...], h, preferred_element_type=f32)
             + bf_ref[...])                                                # (1, TB)
    out_ref[...] = jax.nn.sigmoid(logit)


def _round_up(x, m):
    return ((x + m - 1) // m) * m


def _resident(shape):
    """BlockSpec for a small array that stays VMEM-resident across grid steps."""
    nd = len(shape)
    return pl.BlockSpec(shape, lambda i: (0,) * nd)


def _auto_tile_and_vmem(batch, tile_b):
    """Pick the batch tile + VMEM limit from the chip's VMEM capacity."""
    try:
        cap = int(pltpu.get_tpu_info().vmem_capacity_bytes)
    except Exception:
        cap = 64 * 1024 * 1024              # conservative (v7x-sized VMEM)
    big_vmem = cap >= 96 * 1024 * 1024      # v5e / v6e: 128 MiB physical
    max_tile = 16384 if big_vmem else 8192  # v7x (64 MiB): keep tiles <= 8K
    default_tile = 8192 if big_vmem else 4096
    if tile_b is None:
        tile_b = default_tile
    tb = max(128, min(_round_up(int(tile_b), 128), max_tile))
    tb = min(tb, _round_up(batch, 128))
    # Keep >= 2 grid steps when the batch allows, so both v7x TensorCores get work
    # under dimension_semantics=("parallel",).
    if tb > 128 and pl.cdiv(batch, tb) < 2:
        tb = max(128, _round_up((batch + 1) // 2, 128))
    vmem_limit = min((cap * 3) // 4, 100 * 1024 * 1024)
    return tb, vmem_limit


# ------------------------------ wrapper --------------------------------------
@functools.partial(jax.jit, static_argnames=("tile_b",))
def wide_and_deep_forward(params, X_wide, X_deep, *, tile_b=None):
    """JAX wrapper reproducing WideAndDeep.forward semantics.

    X_wide : [B, n_wide]   float32 (or bfloat16 for reduced HBM traffic)
    X_deep : [B, LG + 3]   small ints (genre multi-hot + gender/age/occupation ids);
                           int8/int16/int32 are streamed as-is (no extra HBM pass).
    returns: float32 [B, 1]
    """
    B, n_wide = X_wide.shape
    lg = X_deep.shape[1] - 3

    # Stream inputs in their narrow native dtypes; only cast when unavoidable.
    if X_wide.dtype not in (jnp.float32, jnp.bfloat16):
        X_wide = X_wide.astype(jnp.float32)
    if X_deep.dtype not in (jnp.int8, jnp.int16, jnp.int32):
        X_deep = X_deep.astype(jnp.int32)

    n_g = params["emb_gender"].shape[0]
    n_a = params["emb_age"].shape[0]
    n_o = params["emb_occupation"].shape[0]
    d_emb = params["emb_gender"].shape[1]
    n_cat = n_g + n_a + n_o

    # --- fold embedding tables into Linear_1; transpose weights for the
    # lane-dense (weights-on-the-left) kernel orientation. All tiny; done once.
    hp = jax.lax.Precision.HIGHEST
    w1 = params["w1"]                       # (lg + 3*d_emb, H1)
    H1 = w1.shape[1]
    H2 = params["w2"].shape[1]
    H3 = params["w3"].shape[1]
    w1g_t = w1[:lg].T                       # (H1, lg)
    w1e = w1[lg:]                           # (3*d_emb, H1)
    w1cat_t = jnp.concatenate(
        [jnp.dot(params["emb_gender"], w1e[0:d_emb], precision=hp),
         jnp.dot(params["emb_age"], w1e[d_emb:2 * d_emb], precision=hp),
         jnp.dot(params["emb_occupation"], w1e[2 * d_emb:3 * d_emb], precision=hp)],
        axis=0).T                           # (H1, n_cat)
    b1c = params["b1"].T                    # (H1, 1)
    w2t = params["w2"].T                    # (H2, H1)
    b2c = params["b2"].T                    # (H2, 1)
    w3t = params["w3"].T                    # (H3, H2)
    b3c = params["b3"].T                    # (H3, 1)
    wfw = params["wf_wide"].T               # (1, n_wide)
    wfd = params["wf_deep"].T               # (1, H3)
    bf = params["bf"]                       # (1, 1)

    weights = (w1g_t, w1cat_t, b1c, w2t, b2c, w3t, b3c, wfw, wfd, bf)

    tb, vmem_limit = _auto_tile_and_vmem(B, tile_b)
    grid = (pl.cdiv(B, tb),)                # no full-array pad: ragged tail over-reads;
                                            # the masked output write / [:B] handles it.

    kernel = functools.partial(
        _wide_and_deep_kernel,
        len_genres=lg, n_gender=n_g, n_age=n_a, n_occupation=n_o)

    in_specs = [
        pl.BlockSpec((tb, n_wide), lambda i: (i, 0)),
        pl.BlockSpec((tb, lg + 3), lambda i: (i, 0)),
    ] + [_resident(w.shape) for w in weights]

    flops = 2 * B * ((lg + n_cat) * H1 + H1 * H2 + H2 * H3 + H3 + n_wide + 1)
    bytes_accessed = (X_wide.size * X_wide.dtype.itemsize
                      + X_deep.size * X_deep.dtype.itemsize
                      + B * 4
                      + sum(int(w.size) * w.dtype.itemsize for w in weights))
    cost = pl.CostEstimate(flops=int(flops), transcendentals=int(B),
                           bytes_accessed=int(bytes_accessed))

    out_row = pl.pallas_call(
        kernel,
        out_shape=jax.ShapeDtypeStruct((1, B), jnp.float32),
        grid=grid,
        in_specs=in_specs,
        out_specs=pl.BlockSpec((1, tb), lambda i: (0, i)),
        compiler_params=pltpu.CompilerParams(
            dimension_semantics=("parallel",),
            vmem_limit_bytes=int(vmem_limit),
        ),
        cost_estimate=cost,
    )(X_wide, X_deep, *weights)

    return out_row.reshape(B, 1)


# ----------------------------- parameter setup ------------------------------
def init_params(key, *, len_genres, n_wide, n_gender, n_age, n_occupation):
    """Deterministic parameter init (shapes mirror the PyTorch __init__)."""
    d_deep_in = 24 + len_genres
    ks = jax.random.split(key, 12)

    def unif(k, shape, fan_in):
        bound = 1.0 / np.sqrt(fan_in)
        return jax.random.uniform(k, shape, jnp.float32, -bound, bound)

    wf_full = unif(ks[9], (n_wide + 16, 1), n_wide + 16)  # final Linear weight
    return {
        "emb_gender": jax.random.normal(ks[0], (n_gender, 8), jnp.float32),
        "emb_age": jax.random.normal(ks[1], (n_age, 8), jnp.float32),
        "emb_occupation": jax.random.normal(ks[2], (n_occupation, 8), jnp.float32),
        "w1": unif(ks[3], (d_deep_in, 64), d_deep_in),
        "b1": unif(ks[4], (1, 64), d_deep_in),
        "w2": unif(ks[5], (64, 32), 64),
        "b2": unif(ks[6], (1, 32), 64),
        "w3": unif(ks[7], (32, 16), 32),
        "b3": unif(ks[8], (1, 16), 32),
        "wf_wide": wf_full[:n_wide, :],
        "wf_deep": wf_full[n_wide:, :],
        "bf": unif(ks[10], (1, 1), n_wide + 16),
    }


def reference_forward(params, X_wide, X_deep):
    """Pure-JAX reference matching the PyTorch forward."""
    genres = X_deep[:, :-3].astype(jnp.float32)
    eg = jnp.take(params["emb_gender"], X_deep[:, -3], axis=0)
    ea = jnp.take(params["emb_age"], X_deep[:, -2], axis=0)
    eo = jnp.take(params["emb_occupation"], X_deep[:, -1], axis=0)
    d = jnp.concatenate([genres, eg, ea, eo], axis=1)
    d = jax.nn.relu(d @ params["w1"] + params["b1"])
    d = jax.nn.relu(d @ params["w2"] + params["b2"])
    d = jax.nn.relu(d @ params["w3"] + params["b3"])
    wad = jnp.concatenate([X_wide.astype(jnp.float32), d], axis=1)
    wf = jnp.concatenate([params["wf_wide"], params["wf_deep"]], axis=0)
    return jax.nn.sigmoid(wad @ wf + params["bf"])


# --------------------------------- main --------------------------------------
if __name__ == "__main__":
    # Small synthetic config. B is chosen so the auto tile gives a multi-step
    # grid AND a ragged last tile (no padding path).
    B = 200            # batch
    LEN_GENRES = 18    # genre multi-hot columns in X_deep
    N_WIDE = 10        # wide feature columns
    N_GENDER, N_AGE, N_OCC = 2, 7, 21

    key = jax.random.PRNGKey(0)
    k_p, k_w, k_g, k_gen, k_age, k_occ = jax.random.split(key, 6)

    params = init_params(
        k_p,
        len_genres=LEN_GENRES,
        n_wide=N_WIDE,
        n_gender=N_GENDER,
        n_age=N_AGE,
        n_occupation=N_OCC,
    )

    X_wide = jax.random.normal(k_w, (B, N_WIDE), jnp.float32)
    # X_deep produced "upstream" as int8 (genre bits and ids < 128 are exact):
    # 4x less HBM read inside the kernel vs int32 -- biggest relative win on v5e.
    genres = jax.random.bernoulli(k_g, 0.3, (B, LEN_GENRES)).astype(jnp.int8)
    gender = jax.random.randint(k_gen, (B, 1), 0, N_GENDER).astype(jnp.int8)
    age = jax.random.randint(k_age, (B, 1), 0, N_AGE).astype(jnp.int8)
    occ = jax.random.randint(k_occ, (B, 1), 0, N_OCC).astype(jnp.int8)
    X_deep = jnp.concatenate([genres, gender, age, occ], axis=1)

    out = wide_and_deep_forward(params, X_wide, X_deep)   # auto tile / VMEM config
    out = jax.block_until_ready(out)

    ref = reference_forward(params, X_wide, X_deep)
    np.testing.assert_allclose(np.asarray(out), np.asarray(ref), rtol=1e-4, atol=1e-4)
    assert out.shape == (B, 1)

    print("KERNEL_OK")
</pallas_src>

<mosaic_0001>
module attributes {stable_mosaic.version = 11 : i64} {
  func.func @_wide_and_deep_kernel(%arg0: i32, %arg1: memref<128x10xf32, #tpu.memory_space<vmem>>, %arg2: memref<128x21xi8, #tpu.memory_space<vmem>>, %arg3: memref<64x18xf32, #tpu.memory_space<vmem>>, %arg4: memref<64x30xf32, #tpu.memory_space<vmem>>, %arg5: memref<64x1xf32, #tpu.memory_space<vmem>>, %arg6: memref<32x64xf32, #tpu.memory_space<vmem>>, %arg7: memref<32x1xf32, #tpu.memory_space<vmem>>, %arg8: memref<16x32xf32, #tpu.memory_space<vmem>>, %arg9: memref<16x1xf32, #tpu.memory_space<vmem>>, %arg10: memref<1x10xf32, #tpu.memory_space<vmem>>, %arg11: memref<1x16xf32, #tpu.memory_space<vmem>>, %arg12: memref<1x1xf32, #tpu.memory_space<vmem>>, %arg13: memref<1x128xf32, #tpu.memory_space<vmem>>) attributes {dimension_semantics = [#tpu.dimension_semantics<parallel>], iteration_bounds = array<i64: 2>, scalar_prefetch = 0 : i64, scratch_operands = 0 : i64, tpu.core_type = #tpu.core_type<tc>, window_params = [{transform_indices = @transform_0, window_bounds = array<i64: 128, 10>}, {transform_indices = @transform_1, window_bounds = array<i64: 128, 21>}, {pipeline_mode = #tpu.pipeline_mode<synchronous>, transform_indices = @transform_2, window_bounds = array<i64: 64, 18>}, {pipeline_mode = #tpu.pipeline_mode<synchronous>, transform_indices = @transform_3, window_bounds = array<i64: 64, 30>}, {pipeline_mode = #tpu.pipeline_mode<synchronous>, transform_indices = @transform_4, window_bounds = array<i64: 64, 1>}, {pipeline_mode = #tpu.pipeline_mode<synchronous>, transform_indices = @transform_5, window_bounds = array<i64: 32, 64>}, {pipeline_mode = #tpu.pipeline_mode<synchronous>, transform_indices = @transform_6, window_bounds = array<i64: 32, 1>}, {pipeline_mode = #tpu.pipeline_mode<synchronous>, transform_indices = @transform_7, window_bounds = array<i64: 16, 32>}, {pipeline_mode = #tpu.pipeline_mode<synchronous>, transform_indices = @transform_8, window_bounds = array<i64: 16, 1>}, {pipeline_mode = #tpu.pipeline_mode<synchronous>, transform_indices = @transform_9, window_bounds = array<i64: 1, 10>}, {pipeline_mode = #tpu.pipeline_mode<synchronous>, transform_indices = @transform_10, window_bounds = array<i64: 1, 16>}, {pipeline_mode = #tpu.pipeline_mode<synchronous>, transform_indices = @transform_11, window_bounds = array<i64: 1, 1>}, {transform_indices = @transform_12, window_bounds = array<i64: 1, 128>}]} {
    %c0 = arith.constant 0 : index
    %c0_0 = arith.constant 0 : index
    %0 = vector.load %arg2[%c0, %c0_0] : memref<128x21xi8, #tpu.memory_space<vmem>>, vector<128x21xi8>
    %1 = arith.extsi %0 : vector<128x21xi8> to vector<128x21xi32>
    %2 = vector.extract_strided_slice %1 {offsets = [0, 0], sizes = [128, 18], strides = [1, 1]} : vector<128x21xi32> to vector<128x18xi32>
    %3 = arith.sitofp %2 : vector<128x18xi32> to vector<128x18xf32>
    %4 = tpu.iota {dimensions = array<i32: 1>} : vector<128x30xi32>
    %5 = vector.extract_strided_slice %1 {offsets = [0, 18], sizes = [128, 1], strides = [1, 1]} : vector<128x21xi32> to vector<128x1xi32>
    %6 = vector.extract_strided_slice %1 {offsets = [0, 19], sizes = [128, 1], strides = [1, 1]} : vector<128x21xi32> to vector<128x1xi32>
    %c2_i32 = arith.constant 2 : i32
    %7 = vector.broadcast %c2_i32 : i32 to vector<128x1xi32>
    %8 = arith.addi %6, %7 : vector<128x1xi32>
    %9 = vector.extract_strided_slice %1 {offsets = [0, 20], sizes = [128, 1], strides = [1, 1]} : vector<128x21xi32> to vector<128x1xi32>
    %c9_i32 = arith.constant 9 : i32
    %10 = vector.broadcast %c9_i32 : i32 to vector<128x1xi32>
    %11 = arith.addi %9, %10 : vector<128x1xi32>
    %12 = vector.broadcast %5 : vector<128x1xi32> to vector<128x30xi32>
    %13 = arith.cmpi eq, %4, %12 : vector<128x30xi32>
    %14 = vector.broadcast %8 : vector<128x1xi32> to vector<128x30xi32>
    %15 = arith.cmpi eq, %4, %14 : vector<128x30xi32>
    %16 = arith.ori %13, %15 : vector<128x30xi1>
    %17 = vector.broadcast %11 : vector<128x1xi32> to vector<128x30xi32>
    %18 = arith.cmpi eq, %4, %17 : vector<128x30xi32>
    %19 = arith.ori %16, %18 : vector<128x30xi1>
    %20 = arith.extui %19 : vector<128x30xi1> to vector<128x30xi32>
    %21 = arith.sitofp %20 : vector<128x30xi32> to vector<128x30xf32>
    %c0_1 = arith.constant 0 : index
    %c0_2 = arith.constant 0 : index
    %22 = vector.load %arg3[%c0_1, %c0_2] : memref<64x18xf32, #tpu.memory_space<vmem>>, vector<64x18xf32>
    %cst = arith.constant dense<0.000000e+00> : vector<64x128xf32>
    %23 = tpu.matmul %22, %3, %cst {dimension_numbers = #tpu.dot_dimension_numbers<[1], [1], [0], [0], [0, 0, 1, 0], [], []>} : vector<64x18xf32>, vector<128x18xf32>, vector<64x128xf32> -> vector<64x128xf32>
    %c0_3 = arith.constant 0 : index
    %c0_4 = arith.constant 0 : index
    %24 = vector.load %arg4[%c0_3, %c0_4] : memref<64x30xf32, #tpu.memory_space<vmem>>, vector<64x30xf32>
    %cst_5 = arith.constant dense<0.000000e+00> : vector<64x128xf32>
    %25 = tpu.matmul %24, %21, %cst_5 {dimension_numbers = #tpu.dot_dimension_numbers<[1], [1], [0], [0], [0, 0, 1, 0], [], []>} : vector<64x30xf32>, vector<128x30xf32>, vector<64x128xf32> -> vector<64x128xf32>
    %26 = arith.addf %23, %25 : vector<64x128xf32>
    %c0_6 = arith.constant 0 : index
    %c0_7 = arith.constant 0 : index
    %27 = vector.load %arg5[%c0_6, %c0_7] : memref<64x1xf32, #tpu.memory_space<vmem>>, vector<64x1xf32>
    %28 = vector.broadcast %27 : vector<64x1xf32> to vector<64x128xf32>
    %29 = arith.addf %26, %28 : vector<64x128xf32>
    %cst_8 = arith.constant 0.000000e+00 : f32
    %30 = vector.broadcast %cst_8 : f32 to vector<64x128xf32>
    %31 = arith.maximumf %29, %30 : vector<64x128xf32>
    %c0_9 = arith.constant 0 : index
    %c0_10 = arith.constant 0 : index
    %32 = vector.load %arg6[%c0_9, %c0_10] : memref<32x64xf32, #tpu.memory_space<vmem>>, vector<32x64xf32>
    %cst_11 = arith.constant dense<0.000000e+00> : vector<32x128xf32>
    %33 = tpu.matmul %32, %31, %cst_11 {dimension_numbers = #tpu.dot_dimension_numbers<[1], [0], [0], [1], [0, 0, 1, 1], [], []>} : vector<32x64xf32>, vector<64x128xf32>, vector<32x128xf32> -> vector<32x128xf32>
    %c0_12 = arith.constant 0 : index
    %c0_13 = arith.constant 0 : index
    %34 = vector.load %arg7[%c0_12, %c0_13] : memref<32x1xf32, #tpu.memory_space<vmem>>, vector<32x1xf32>
    %35 = vector.broadcast %34 : vector<32x1xf32> to vector<32x128xf32>
    %36 = arith.addf %33, %35 : vector<32x128xf32>
    %cst_14 = arith.constant 0.000000e+00 : f32
    %37 = vector.broadcast %cst_14 : f32 to vector<32x128xf32>
    %38 = arith.maximumf %36, %37 : vector<32x128xf32>
    %c0_15 = arith.constant 0 : index
    %c0_16 = arith.constant 0 : index
    %39 = vector.load %arg8[%c0_15, %c0_16] : memref<16x32xf32, #tpu.memory_space<vmem>>, vector<16x32xf32>
    %cst_17 = arith.constant dense<0.000000e+00> : vector<16x128xf32>
    %40 = tpu.matmul %39, %38, %cst_17 {dimension_numbers = #tpu.dot_dimension_numbers<[1], [0], [0], [1], [0, 0, 1, 1], [], []>} : vector<16x32xf32>, vector<32x128xf32>, vector<16x128xf32> -> vector<16x128xf32>
    %c0_18 = arith.constant 0 : index
    %c0_19 = arith.constant 0 : index
    %41 = vector.load %arg9[%c0_18, %c0_19] : memref<16x1xf32, #tpu.memory_space<vmem>>, vector<16x1xf32>
    %42 = vector.broadcast %41 : vector<16x1xf32> to vector<16x128xf32>
    %43 = arith.addf %40, %42 : vector<16x128xf32>
    %cst_20 = arith.constant 0.000000e+00 : f32
    %44 = vector.broadcast %cst_20 : f32 to vector<16x128xf32>
    %45 = arith.maximumf %43, %44 : vector<16x128xf32>
    %c0_21 = arith.constant 0 : index
    %c0_22 = arith.constant 0 : index
    %46 = vector.load %arg1[%c0_21, %c0_22] : memref<128x10xf32, #tpu.memory_space<vmem>>, vector<128x10xf32>
    %c0_23 = arith.constant 0 : index
    %c0_24 = arith.constant 0 : index
    %47 = vector.load %arg10[%c0_23, %c0_24] : memref<1x10xf32, #tpu.memory_space<vmem>>, vector<1x10xf32>
    %cst_25 = arith.constant dense<0.000000e+00> : vector<1x128xf32>
    %48 = tpu.matmul %47, %46, %cst_25 {dimension_numbers = #tpu.dot_dimension_numbers<[1], [1], [0], [0], [0, 0, 1, 0], [], []>} : vector<1x10xf32>, vector<128x10xf32>, vector<1x128xf32> -> vector<1x128xf32>
    %c0_26 = arith.constant 0 : index
    %c0_27 = arith.constant 0 : index
    %49 = vector.load %arg11[%c0_26, %c0_27] : memref<1x16xf32, #tpu.memory_space<vmem>>, vector<1x16xf32>
    %cst_28 = arith.constant dense<0.000000e+00> : vector<1x128xf32>
    %50 = tpu.matmul %49, %45, %cst_28 {dimension_numbers = #tpu.dot_dimension_numbers<[1], [0], [0], [1], [0, 0, 1, 1], [], []>} : vector<1x16xf32>, vector<16x128xf32>, vector<1x128xf32> -> vector<1x128xf32>
    %51 = arith.addf %48, %50 : vector<1x128xf32>
    %c0_29 = arith.constant 0 : index
    %c0_30 = arith.constant 0 : index
    %52 = vector.load %arg12[%c0_29, %c0_30] : memref<1x1xf32, #tpu.memory_space<vmem>>, vector<1x1xf32>
    %53 = vector.broadcast %52 : vector<1x1xf32> to vector<1x128xf32>
    %54 = arith.addf %51, %53 : vector<1x128xf32>
    %55 = arith.negf %54 : vector<1x128xf32>
    %56 = math.exp %55 : vector<1x128xf32>
    %cst_31 = arith.constant 1.000000e+00 : f32
    %57 = vector.broadcast %cst_31 : f32 to vector<1x128xf32>
    %58 = arith.addf %57, %56 : vector<1x128xf32>
    %59 = arith.divf %57, %58 : vector<1x128xf32>
    %c0_32 = arith.constant 0 : index
    %c0_33 = arith.constant 0 : index
    %60 = vector.load %arg13[%c0_32, %c0_33] : memref<1x128xf32, #tpu.memory_space<vmem>>, vector<1x128xf32>
    tpu.vector_store %arg13[%c0_32, %c0_33], %59 {strides = array<i32>} : memref<1x128xf32, #tpu.memory_space<vmem>>, vector<1x128xf32>,
    return
  }
  func.func @transform_0(%arg0: i32) -> (i32, i32) {
    %c0_i32 = arith.constant 0 : i32
    %c0_i32_0 = arith.constant 0 : i32
    return %arg0, %c0_i32 : i32, i32
  }
  func.func @transform_1(%arg0: i32) -> (i32, i32) {
    %c0_i32 = arith.constant 0 : i32
    %c0_i32_0 = arith.constant 0 : i32
    return %arg0, %c0_i32 : i32, i32
  }
  func.func @transform_2(%arg0: i32) -> (i32, i32) {
    %c0_i32 = arith.constant 0 : i32
    %c0_i32_0 = arith.constant 0 : i32
    %c0_i32_1 = arith.constant 0 : i32
    return %c0_i32, %c0_i32_0 : i32, i32
  }
  func.func @transform_3(%arg0: i32) -> (i32, i32) {
    %c0_i32 = arith.constant 0 : i32
    %c0_i32_0 = arith.constant 0 : i32
    %c0_i32_1 = arith.constant 0 : i32
    return %c0_i32, %c0_i32_0 : i32, i32
  }
  func.func @transform_4(%arg0: i32) -> (i32, i32) {
    %c0_i32 = arith.constant 0 : i32
    %c0_i32_0 = arith.constant 0 : i32
    %c0_i32_1 = arith.constant 0 : i32
    return %c0_i32, %c0_i32_0 : i32, i32
  }
  func.func @transform_5(%arg0: i32) -> (i32, i32) {
    %c0_i32 = arith.constant 0 : i32
    %c0_i32_0 = arith.constant 0 : i32
    %c0_i32_1 = arith.constant 0 : i32
    return %c0_i32, %c0_i32_0 : i32, i32
  }
  func.func @transform_6(%arg0: i32) -> (i32, i32) {
    %c0_i32 = arith.constant 0 : i32
    %c0_i32_0 = arith.constant 0 : i32
    %c0_i32_1 = arith.constant 0 : i32
    return %c0_i32, %c0_i32_0 : i32, i32
  }
  func.func @transform_7(%arg0: i32) -> (i32, i32) {
    %c0_i32 = arith.constant 0 : i32
    %c0_i32_0 = arith.constant 0 : i32
    %c0_i32_1 = arith.constant 0 : i32
    return %c0_i32, %c0_i32_0 : i32, i32
  }
  func.func @transform_8(%arg0: i32) -> (i32, i32) {
    %c0_i32 = arith.constant 0 : i32
    %c0_i32_0 = arith.constant 0 : i32
    %c0_i32_1 = arith.constant 0 : i32
    return %c0_i32, %c0_i32_0 : i32, i32
  }
  func.func @transform_9(%arg0: i32) -> (i32, i32) {
    %c0_i32 = arith.constant 0 : i32
    %c0_i32_0 = arith.constant 0 : i32
    %c0_i32_1 = arith.constant 0 : i32
    return %c0_i32, %c0_i32_0 : i32, i32
  }
  func.func @transform_10(%arg0: i32) -> (i32, i32) {
    %c0_i32 = arith.constant 0 : i32
    %c0_i32_0 = arith.constant 0 : i32
    %c0_i32_1 = arith.constant 0 : i32
    return %c0_i32, %c0_i32_0 : i32, i32
  }
  func.func @transform_11(%arg0: i32) -> (i32, i32) {
    %c0_i32 = arith.constant 0 : i32
    %c0_i32_0 = arith.constant 0 : i32
    %c0_i32_1 = arith.constant 0 : i32
    return %c0_i32, %c0_i32_0 : i32, i32
  }
  func.func @transform_12(%arg0: i32) -> (i32, i32) {
    %c0_i32 = arith.constant 0 : i32
    %c0_i32_0 = arith.constant 0 : i32
    return %c0_i32, %arg0 : i32, i32
  }
}

</mosaic_0001>

<bundles_post_ra>
// kernel: wide_and_deep_forward.1
= control target key start
LH: loop header
LB: loop body
LE: loop exit
PB: predicated region body
PF: predicated region fallthrough
CT: control target
= control target key end

     0   :  { %s3087_s0 = inlined_call_operand.vmem [shape: f32[200,10], index: 0, kind: input, shape index: {}]   ;;  %s3088_s1 = inlined_call_operand.vmem [shape: s8[200,21], index: 1, kind: input, shape index: {}]   ;;  %s3089_s2 = inlined_call_operand.vmem [shape: f32[64,18], index: 2, kind: input, shape index: {}]   ;;  %s3090_s3 = inlined_call_operand.vmem [shape: f32[64,30], index: 3, kind: input, shape index: {}]   ;;  %s3091_s4 = inlined_call_operand.vmem [shape: f32[64,1], index: 4, kind: input, shape index: {}]   ;;  %s3092_s5 = inlined_call_operand.vmem [shape: f32[32,64], index: 5, kind: input, shape index: {}]   ;;  %s3093_s6 = inlined_call_operand.vmem [shape: f32[32,1], index: 6, kind: input, shape index: {}]   ;;  %s3094_s7 = inlined_call_operand.vmem [shape: f32[16,32], index: 7, kind: input, shape index: {}]   ;;  %s3095_s8 = inlined_call_operand.vmem [shape: f32[16,1], index: 8, kind: input, shape index: {}]   ;;  %s3096_s9 = inlined_call_operand.vmem [shape: f32[1,10], index: 9, kind: input, shape index: {}]   ;;  %s3097_s10 = inlined_call_operand.vmem [shape: f32[1,16], index: 10, kind: input, shape index: {}]   ;;  %s3098_s11 = inlined_call_operand.<no memory space> [shape: f32[1,1], index: 11, kind: input, shape index: {}]   ;;  %s3099_s12 = inlined_call_operand.hbm [shape: f32[1,200], index: 12, kind: output, shape index: {}]  }
   0x1   :  { %3100 = sst [smem:[#allocation6_spill]] %s3087_s0  ;;  %v17_v0 = vstv %s3098_s11 }
   0x2   :  { %18 = vst [vmem:[#allocation2] sm:$0x1] %v17_v0 }
   0x3   :  { %19 = vsyncpa [#allocation4], 0 }
   0x4   :  { %21 = vsyncpa [#allocation4 + $0x1], 0  ;;  %s2578_s23 = smov 0   ;;  %s2580_s24 = smov 0  }
   0x5   :  { %s2582_s25 = smov 0   ;;  %s2584_s26 = smov 0  }
   0x6 LB: > { %s1790_s11 = sadd.s32 4294967295, %s2500_s26   ;;  %s1791_s27 = sadd.s32 4294967294, %s2500_s26   ;;  %s2500_s26 = sphi %s2584_s26, %s3113_s26   ;;  %s2496_s25 = sphi %s2582_s25, %s3112_s25   ;;  %s2492_s24 = sphi %s2580_s24, %s3111_s24   ;;  %s2488_s23 = sphi %s2578_s23, %s3110_s23  }
   0x7   : > { %s2601_s28 = sadd.s32 1, %s2500_s26   ;;  %s296_s29 = sadd.s32 1, %s2496_s25 }
   0x8   : > { %s293_s30 = ssub.s32 %s2500_s26, %s2601_s28  ;;  %p306_p0 = scmp.ne.s32.totalorder %s2496_s25, %s2492_s24 }
   0x9   : > { %p294_p1 = scmp.eq.s32.totalorder %s293_s30, 0  ;;  %p307_p2 = scmp.eq.s32.totalorder %s1790_s11, 1 }
   0xa   : > { %p312_p3 = scmp.ne.s32.totalorder %s2492_s24, %s2488_s23  ;;  %p313_p4 = scmp.eq.s32.totalorder %s1791_s27, 1 }
   0xb   : > { %s2611_s13 = scalar_select %p294_p1, %s2496_s25, %s296_s29  }
   0xc   : > { %p2613_p5 = por %p307_p2, %p306_p0  ;;  %p2617_p6 = por %p313_p4, %p312_p3 }
   0xd   : > { %p1794_p7 = scmp.ge.s32.totalorder %s2500_s26, 1  ;;  %p395_p8 = scmp.lt.s32.totalorder %s2500_s26, 3 }
   0xf   : > { %p396_p9 = pnand %p1794_p7, %p395_p8 }
  0x10   : > { %s2623_s16 = sshll.u32 (!%p396_p9), %s1790_s11, 4  ;;  %v2502_v1 = vmov (!%p396_p9), 18   ;;  %v2503_v2 = vmov (!%p396_p9), 20   ;;  %v2504_v13 = vmov (!%p396_p9), 19   ;;  %v525_v0 = vlaneseq (!%p396_p9)  ;;  %s3107_s0 = sld [smem:[#allocation6_spill]] (!%p396_p9) }
  0x11   : > { %399 = sbr.rel (%p396_p9) target bundleno = 1387 (0x56b), region = 68  ;;  %2404 = vset.pattern.permute.xlu1 (!%p396_p9), %v2502_v1  ;;  %p454_p10 = scmp.lt.s32.totalorder (!%p396_p9), %s2623_s16, 24  ;;  %2406 = vset.pattern.permute.xlu0 (!%p396_p9), %v2503_v2  ;;  %vm831_vm7 = vcmask (!%p396_p9), 244736  }
  0x12   : > { %vm2721_vm12 = vmpackc.low (!%p396_p9), %vm831_vm7, %vm831_vm7  ;;  %s447_s20 = sand.u32 (!%p396_p9), 1, %s2492_s24  }
  0x13   : > { %s1712_s30 = scalar_lea.sflag (!%p396_p9), [#allocation4], %s447_s20 }
  0x18   : > { %s2629_s17 = scalar_select %p454_p10, %s2623_s16, 24 }
  0x1a   : > { %s1798_s18 = sshll.u32 %s2629_s17, 1  ;;  %s1796_s22 = sshll.u32 %s2629_s17, 3 }
  0x1b   : > { %s2635_s21 = scalar_lea.vmem %s3088_s1, %s1798_s18  ;;  %s2990_s29 = scalar_lea.vmem %s3107_s0, %s1796_s22 }
  0x1c   : > { %v2638_v3 = vld [vmem:[%s2635_s21 + $0x4] sm:$0xf]   ;;  %v2641_v4 = vld [vmem:[%s2635_s21] sm:$0xf]   ;;  %v2646_v7 = vld [vmem:[%s2635_s21 + $0x8] sm:$0xf]  }
  0x1d   : > { %v1897_v5 = vunpack.c.0.s8 %v2638_v3  ;;  %v1893_v6 = vunpack.c.0.s8 %v2641_v4  ;;  %v1894_v10 = vunpack.c.1.s8 %v2641_v4  ;;  %v1901_v12 = vunpack.c.0.s8 %v2646_v7  ;;  %v2657_v22 = vld [vmem:[%s2635_s21 + $0xc] sm:$0xf]   ;;  %v2662_v24 = vld [vmem:[%s2635_s21 + $0x10] sm:$0xf]   ;;  %v2667_v26 = vld [vmem:[%s2635_s21 + $0x14] sm:$0xf]  }
  0x1e   : > { %v1898_v18 = vunpack.c.1.s8 %v2638_v3  ;;  %v1902_v20 = vunpack.c.1.s8 %v2646_v7  ;;  %v1906_v23 = vunpack.c.1.s8 %v2657_v22  ;;  %v1910_v25 = vunpack.c.1.s8 %v2662_v24  ;;  %v2675_v35 = vld [vmem:[%s2635_s21 + $0x18] sm:$0xf]   ;;  %v2683_v42 = vld [vmem:[%s2635_s21 + $0x1c] sm:$0xf]   ;;  %s448_s21 = scalar_lea.vmem [#allocation3], %s447_s20  ;;  %s2509_s17 = smov [#allocation3]  }
  0x1f   : > { %566 = vperm.xlu1 %2404, %v1897_v5   ;;  %v543_v8 = vadd.s32 9, %v1893_v6  ;;  %v527_v9 = vadd.s32 2, %v1893_v6  ;;  %v545_v11 = vadd.s32 9, %v1897_v5  ;;  %v528_v14 = vadd.s32 2, %v1894_v10  ;;  %s1724_s22 = sshll.u32 %s448_s21, 4  ;;  %s2442_s19 = sshll.u32 %s2509_s17, 4  ;;  %s3047_s22 = int_to_ptr.vmem [resolvable:$true] %s1724_s22  ;;  %s2443_s19 = int_to_ptr.vmem [resolvable:$false] %s2442_s19 }
  0x20   : > { %v547_v15 = vadd.s32 9, %v1901_v12  ;;  %v544_v16 = vadd.s32 9, %v1894_v10  ;;  %v529_v17 = vadd.s32 2, %v1897_v5  ;;  %v530_v19 = vadd.s32 2, %v1898_v18  ;;  %s2438_s18 = scalar_lea.vmem %s3047_s22, 16  ;;  %s2444_s0 = scalar_lea.vmem %s2443_s19, 32 }
  0x21   : > { %704 = vperm.xlu0 %2406, %v543_v8   ;;  %v546_v21 = vadd.s32 9, %v1898_v18  ;;  %v531_v27 = vadd.s32 2, %v1901_v12  ;;  %v1914_v28 = vunpack.c.1.s8 %v2667_v26  ;;  %v532_v29 = vadd.s32 2, %v1902_v20  ;;  %p2439_p11 = scmp.ne.s32.totalorder %s3047_s22, %s2438_s18  ;;  %p2445_p0 = scmp.lt.s32.totalorder %s3047_s22, %s2443_s19 }
  0x22   : > { %v1905_v30 = vunpack.c.0.s8 %v2657_v22  ;;  %v1909_v32 = vunpack.c.0.s8 %v2662_v24  ;;  %v548_v33 = vadd.s32 9, %v1902_v20  ;;  %v1913_v36 = vunpack.c.0.s8 %v2667_v26  ;;  %p2446_p1 = scmp.lt.s32.totalorder %s2444_s0, %s2438_s18 }
  0x23   : > { %2405 = vset.pattern.permute.xlu1 %v2504_v13  ;;  %v1917_v38 = vunpack.c.0.s8 %v2675_v35  ;;  %v534_v41 = vadd.s32 2, %v1906_v23  ;;  %v1918_v43 = vunpack.c.1.s8 %v2675_v35  ;;  %v1922_v44 = vunpack.c.1.s8 %v2683_v42  ;;  %p2440_p12 = pnand %p2439_p11, %p2613_p5 }
  0x24   : > { %624 = vperm.xlu1 %2405, %v527_v9   ;;  %v549_v31 = vadd.s32 9, %v1905_v30  ;;  %v551_v34 = vadd.s32 9, %v1909_v32  ;;  %v553_v37 = vadd.s32 9, %v1913_v36  ;;  %v533_v40 = vadd.s32 2, %v1905_v30  ;;  %p2447_p2 = por %p2446_p1, %p2445_p0 }
  0x25   : > { %710 = vperm.xlu0 %2406, %v545_v11   ;;  %v555_v39 = vadd.s32 9, %v1917_v38  ;;  %v550_v45 = vadd.s32 9, %v1906_v23  ;;  %v1921_v46 = vunpack.c.0.s8 %v2683_v42  ;;  %v535_v48 = vadd.s32 2, %v1909_v32  ;;  %p2441_p13 = pneg %p2440_p12 }
  0x26   : > { %v536_v49 = vadd.s32 2, %v1910_v25  ;;  %v552_v50 = vadd.s32 9, %v1910_v25  ;;  %v537_v51 = vadd.s32 2, %v1913_v36  ;;  %v538_v52 = vadd.s32 2, %v1914_v28 }
  0x27   : > { %v557_v47 = vadd.s32 9, %v1921_v46  ;;  %v554_v53 = vadd.s32 9, %v1914_v28  ;;  %v539_v54 = vadd.s32 2, %v1917_v38  ;;  %v540_v55 = vadd.s32 2, %v1918_v43  ;;  %p2448_p3 = pnand %p2447_p2, %p2441_p13 }
  0x28   : > { %627 = vperm.xlu1 %2405, %v528_v14   ;;  %v556_v56 = vadd.s32 9, %v1918_v43  ;;  %v541_v59 = vadd.s32 2, %v1921_v46  ;;  %v542_v62 = vadd.s32 2, %v1922_v44  ;;  %v2703_v8 = vand.u32 127, %v525_v0 }
  0x29   : > { %716 = vperm.xlu0 %2406, %v547_v15   ;;  %v2505_v14 = vmov 0.0  }
  0x2c   : > { %2407 = vset.pattern.permute.xlu1 %v2503_v2 }
  0x2d   : > { %2412 = vset.pattern.permute.xlu0 %v2502_v1  ;;  %707 = vperm.xlu1 %2407, %v544_v16  }
  0x2e   : > { %560 = vperm.xlu0 %2412, %v1893_v6   ;;  %v558_v6 = vadd.s32 9, %v1922_v44 }
  0x31   : > { %2408 = vset.pattern.permute.xlu1 %v2504_v13 }
  0x32   : > { %563 = vperm.xlu0 %2412, %v1894_v10   ;;  %630 = vperm.xlu1 %2408, %v529_v17   ;;  %v826_v17 = vld [vmem:[%s3090_s3 + $0x18] sm:$0xff] }
  0x36   : > { %569 = vperm.xlu0 %2412, %v1898_v18   ;;  %633 = vperm.xlu1 %2408, %v530_v19  }
  0x3a   : > { %2409 = vset.pattern.permute.xlu1 %v2503_v2  ;;  %575 = vperm.xlu0 %2412, %v1902_v20  }
  0x3b   : > { %713 = vperm.xlu1 %2409, %v546_v21  }
  0x3e   : > { %581 = vperm.xlu0 %2412, %v1906_v23  }
  0x3f   : > { %2410 = vset.pattern.permute.xlu1 %v2502_v1 }
  0x40   : > { %572 = vperm.xlu1 %2410, %v1901_v12  }
  0x42   : > { %587 = vperm.xlu0 %2412, %v1910_v25  }
  0x44   : > { %2411 = vset.pattern.permute.xlu1 %v2504_v13 }
  0x45   : > { %636 = vperm.xlu1 %2411, %v531_v27  }
  0x46   : > { %593 = vperm.xlu0 %2412, %v1914_v28  }
  0x49   : > { %639 = vperm.xlu1 %2411, %v532_v29  }
  0x4a   : > { %2421 = vset.pattern.permute.xlu0 %v2503_v2 }
  0x4b   : > { %722 = vperm.xlu0 %2421, %v549_v31  }
  0x4d   : > { %2413 = vset.pattern.permute.xlu1 %v2503_v2 }
  0x4e   : > { %719 = vperm.xlu1 %2413, %v548_v33  }
  0x4f   : > { %728 = vperm.xlu0 %2421, %v551_v34  }
  0x52   : > { %2414 = vset.pattern.permute.xlu1 %v2502_v1 }
  0x53   : > { %578 = vperm.xlu1 %2414, %v1905_v30   ;;  %734 = vperm.xlu0 %2421, %v553_v37  }
  0x57   : > { %2415 = vset.pattern.permute.xlu1 %v2504_v13  ;;  %740 = vperm.xlu0 %2421, %v555_v39  }
  0x58   : > { %642 = vperm.xlu1 %2415, %v533_v40  }
  0x5b   : > { %2426 = vset.pattern.permute.xlu0 %v2502_v1 }
  0x5c   : > { %645 = vperm.xlu1 %2415, %v534_v41   ;;  %599 = vperm.xlu0 %2426, %v1918_v43  }
  0x60   : > { %2416 = vset.pattern.permute.xlu1 %v2503_v2  ;;  %605 = vperm.xlu0 %2426, %v1922_v44  }
  0x61   : > { %725 = vperm.xlu1 %2416, %v550_v45  }
  0x64   : > { %2430 = vset.pattern.permute.xlu0 %v2503_v2 }
  0x65   : > { %2417 = vset.pattern.permute.xlu1 %v2502_v1  ;;  %746 = vperm.xlu0 %2430, %v557_v47  }
  0x66   : > { %584 = vperm.xlu1 %2417, %v1909_v32  }
  0x6a   : > { %2418 = vset.pattern.permute.xlu1 %v2504_v13 }
  0x6b   : > { %648 = vperm.xlu1 %2418, %v535_v48  }
  0x6f   : > { %651 = vperm.xlu1 %2418, %v536_v49  }
  0x73   : > { %2419 = vset.pattern.permute.xlu1 %v2503_v2 }
  0x74   : > { %731 = vperm.xlu1 %2419, %v552_v50  }
  0x78   : > { %2420 = vset.pattern.permute.xlu1 %v2502_v1 }
  0x79   : > { %590 = vperm.xlu1 %2420, %v1913_v36  }
  0x7d   : > { %2422 = vset.pattern.permute.xlu1 %v2504_v13 }
  0x7e   : > { %654 = vperm.xlu1 %2422, %v537_v51  }
  0x82   : > { %657 = vperm.xlu1 %2422, %v538_v52  }
  0x86   : > { %2423 = vset.pattern.permute.xlu1 %v2503_v2 }
  0x87   : > { %737 = vperm.xlu1 %2423, %v554_v53  }
  0x8b   : > { %2424 = vset.pattern.permute.xlu1 %v2502_v1 }
  0x8c   : > { %596 = vperm.xlu1 %2424, %v1917_v38  }
  0x90   : > { %2425 = vset.pattern.permute.xlu1 %v2504_v13 }
  0x91   : > { %660 = vperm.xlu1 %2425, %v539_v54  }
  0x95   : > { %663 = vperm.xlu1 %2425, %v540_v55  }
  0x99   : > { %2427 = vset.pattern.permute.xlu1 %v2503_v2 }
  0x9a   : > { %743 = vperm.xlu1 %2427, %v556_v56  }
  0x9e   : > { %v567_v57 = vpop.permute.xlu1 %566  ;;  %2428 = vset.pattern.permute.xlu1 %v2502_v1 }
  0x9f   : > { %602 = vperm.xlu1 %2428, %v1921_v46   ;;  %vm609_vm13 = vcmp.eq.s32.totalorder %v2703_v8, %v567_v57 }
  0xa0   : > { %v705_v58 = vpop.permute.xlu0 %704 }
  0xa1   : > { %vm751_vm2 = vcmp.eq.s32.totalorder %v2703_v8, %v705_v58 }
  0xa3   : > { %2429 = vset.pattern.permute.xlu1 %v2504_v13  ;;  %v625_v60 = vpop.permute.xlu1 %624 }
  0xa4   : > { %666 = vperm.xlu1 %2429, %v541_v59   ;;  %v711_v61 = vpop.permute.xlu0 %710  ;;  %vm671_vm0 = vcmp.eq.s32.totalorder %v2703_v8, %v625_v60  ;;  %v1187_v60 = vld [vmem:[%s3091_s4] sm:$0xff] }
  0xa5   : > { %vm753_vm14 = vcmp.eq.s32.totalorder %v2703_v8, %v711_v61  ;;  %v1188_v61 = vld [vmem:[%s3091_s4 + $0x8] sm:$0xff] }
  0xa7   : > { %v628_v63 = vpop.permute.xlu1 %627 }
  0xa8   : > { %669 = vperm.xlu1 %2429, %v542_v62   ;;  %v717_v5 = vpop.permute.xlu0 %716  ;;  %vm672_vm4 = vcmp.eq.s32.totalorder %v2703_v8, %v628_v63  ;;  %v2506_v62 = vmov 0  }
  0xa9   : > { %2433 = vset.pattern.permute.xlu0 %v2506_v62 }
  0xaa   : > { %1202 = vperm.xlu0 %2433, %v1188_v61  }
  0xac   : > { %2431 = vset.pattern.permute.xlu1 %v2503_v2  ;;  %v708_v1 = vpop.permute.xlu1 %707  ;;  %v823_v2 = vld [vmem:[%s3090_s3] sm:$0xff] }
  0xad   : > { %v561_v9 = vpop.permute.xlu0 %560  ;;  %749 = vperm.xlu1 %2431, %v558_v6   ;;  %vm752_vm8 = vcmp.eq.s32.totalorder %v2703_v8, %v708_v1  ;;  %2041 = vmatprep.mubr.msk.f32.mxu0 %vm831_vm7, %v823_v2  ;;  %v1189_v6 = vld [vmem:[%s3091_s4 + $0x10] sm:$0xff] }
  0xae   : > { %vm607_vm1 = vcmp.eq.s32.totalorder %v2703_v8, %v561_v9  ;;  %v1191_v9 = vld [vmem:[%s3091_s4 + $0x20] sm:$0xff]  ;;  %v1193_v2 = vld [vmem:[%s3091_s4 + $0x30] sm:$0xff] }
  0xaf   : > { %vm687_vm3 = vmor %vm607_vm1, %vm671_vm0  ;;  %1217 = vperm.xlu0 %2433, %v1191_v9  }
  0xb0   : > { %vm767_vm5 = vmor %vm687_vm3, %vm751_vm2 }
  0xb1   : > { %v564_v10 = vpop.permute.xlu0 %563  ;;  %v631_v11 = vpop.permute.xlu1 %630  ;;  %v1799_v15 = vsel %vm767_vm5, 1.0, %v2505_v14  ;;  %2432 = vset.pattern.permute.xlu1 %v2506_v62 }
  0xb2   : > { %vm608_vm6 = vcmp.eq.s32.totalorder %v2703_v8, %v564_v10  ;;  %vm673_vm11 = vcmp.eq.s32.totalorder %v2703_v8, %v631_v11  ;;  %1197 = vperm.xlu1 %2432, %v1187_v60   ;;  %v1190_v11 = vld [vmem:[%s3091_s4 + $0x18] sm:$0xff] }
  0xb3   : > { %vm688_vm9 = vmor %vm608_vm6, %vm672_vm4  ;;  %1227 = vperm.xlu0 %2433, %v1193_v2  }
  0xb4   : > { %vm768_vm10 = vmor %vm688_vm9, %vm752_vm8  ;;  %vm755_vm9 = vcmp.eq.s32.totalorder %v2703_v8, %v717_v5 }
  0xb5   : > { %v570_v12 = vpop.permute.xlu0 %569  ;;  %v634_v13 = vpop.permute.xlu1 %633  ;;  %v1800_v16 = vsel %vm768_vm10, 1.0, %v2505_v14  ;;  %vm689_vm15 = vmor %vm609_vm13, %vm673_vm11 }
  0xb6   : > { %v2172_v18 = vpack.c.bf16 %v1800_v16, %v1799_v15  ;;  %vm610_vm0 = vcmp.eq.s32.totalorder %v2703_v8, %v570_v12  ;;  %vm674_vm1 = vcmp.eq.s32.totalorder %v2703_v8, %v634_v13  ;;  %vm769_vm2 = vmor %vm689_vm15, %vm753_vm14  ;;  %1207 = vperm.xlu1 %2432, %v1189_v6   ;;  %v1192_v15 = vld [vmem:[%s3091_s4 + $0x28] sm:$0xff]  ;;  %v1255_v16 = vld [vmem:[%s3093_s6] sm:$0xff] }
  0xb7   : > { %vm690_vm3 = vmor %vm610_vm0, %vm674_vm1  ;;  %v1801_v20 = vsel %vm769_vm2, 1.0, %v2505_v14  ;;  %1261 = vperm.xlu0 %2433, %v1255_v16  }
  0xb8   : > { %2174 = vmatprep.subr.msk.bf16.mxu0 %vm2721_vm12, %v2172_v18 }
  0xb9   : > { %2177 = vmatpush3.bf16.xpose.msk.msra.mxu0 %vm2721_vm12, %v2172_v18  ;;  %v576_v27 = vpop.permute.xlu0 %575 }
  0xba   : > { %v714_v19 = vpop.permute.xlu1 %713  ;;  %vm612_vm11 = vcmp.eq.s32.totalorder %v2703_v8, %v576_v27  ;;  %1212 = vperm.xlu1 %2432, %v1190_v11   ;;  %v1383_v27 = vld [vmem:[%s3095_s8] sm:$0xff] }
  0xbb   : > { %vm754_vm4 = vcmp.eq.s32.totalorder %v2703_v8, %v714_v19 }
  0xbc   : > { %vm770_vm5 = vmor %vm690_vm3, %vm754_vm4 }
  0xbd   : > { %v1802_v21 = vsel %vm770_vm5, 1.0, %v2505_v14  ;;  %v582_v30 = vpop.permute.xlu0 %581 }
  0xbe   : > { %v2178_v23 = vpack.c.bf16 %v1802_v21, %v1801_v20  ;;  %1222 = vperm.xlu1 %2432, %v1192_v15   ;;  %v1194_v20 = vld [vmem:[%s3091_s4 + $0x38] sm:$0xff]  ;;  %v1257_v21 = vld [vmem:[%s3093_s6 + $0x10] sm:$0xff] }
  0xbf   : > { %v573_v25 = vpop.permute.xlu1 %572  ;;  %1271 = vperm.xlu0 %2433, %v1257_v21  }
  0xc0   : > { %2180 = vmatprep.subr.msk.bf16.mxu0 %vm2721_vm12, %v2178_v23  ;;  %vm611_vm8 = vcmp.eq.s32.totalorder %v2703_v8, %v573_v25  ;;  %v1256_v25 = vld [vmem:[%s3093_s6 + $0x8] sm:$0xff] }
  0xc1   : > { %2183 = vmatpush3.bf16.xpose.msk.msra.mxu0 %vm2721_vm12, %v2178_v23  ;;  %v588_v32 = vpop.permute.xlu0 %587 }
  0xc2   : > { %1232 = vperm.xlu1 %2432, %v1194_v20  }
  0xc3   : > { %1387 = vperm.xlu0 %2433, %v1383_v27  }
  0xc4   : > { %v637_v28 = vpop.permute.xlu1 %636 }
  0xc5   : > { %vm675_vm6 = vcmp.eq.s32.totalorder %v2703_v8, %v637_v28  ;;  %v594_v38 = vpop.permute.xlu0 %593 }
  0xc6   : > { %vm691_vm10 = vmor %vm611_vm8, %vm675_vm6  ;;  %vm614_vm6 = vcmp.eq.s32.totalorder %v2703_v8, %v582_v30  ;;  %1266 = vperm.xlu1 %2432, %v1256_v25  }
  0xc7   : > { %vm771_vm14 = vmor %vm691_vm10, %vm755_vm9 }
  0xc8   : > { %v640_v29 = vpop.permute.xlu1 %639  ;;  %v1803_v33 = vsel %vm771_vm14, 1.0, %v2505_v14 }
  0xc9   : > { %vm676_vm13 = vcmp.eq.s32.totalorder %v2703_v8, %v640_v29 }
  0xca   : > { %vm692_vm15 = vmor %vm612_vm11, %vm676_vm13  ;;  %v723_v40 = vpop.permute.xlu0 %722 }
  0xcb   : > { %vm757_vm5 = vcmp.eq.s32.totalorder %v2703_v8, %v723_v40 }
  0xcd   : > { %v720_v31 = vpop.permute.xlu1 %719 }
  0xce   : > { %vm756_vm0 = vcmp.eq.s32.totalorder %v2703_v8, %v720_v31  ;;  %v729_v49 = vpop.permute.xlu0 %728  ;;  %v1258_v31 = vld [vmem:[%s3093_s6 + $0x18] sm:$0xff] }
  0xcf   : > { %vm772_vm1 = vmor %vm692_vm15, %vm756_vm0  ;;  %1276 = vperm.xlu1 %2432, %v1258_v31  }
  0xd0   : > { %v1804_v34 = vsel %vm772_vm1, 1.0, %v2505_v14  ;;  %vm759_vm1 = vcmp.eq.s32.totalorder %v2703_v8, %v729_v49  ;;  %v2346_v49 = vunpack.c.l.s8.bf16 %v2646_v7  ;;  %v815_v7 = vld [vmem:[%s3089_s2] sm:$0xff] }
  0xd1   : > { %v2184_v36 = vpack.c.bf16 %v1804_v34, %v1803_v33  ;;  %v1693_v33 = vld [vmem:[#allocation2] sm:$0x1] }
  0xd2   : > { %v579_v37 = vpop.permute.xlu1 %578  ;;  %v735_v57 = vpop.permute.xlu0 %734  ;;  %1696 = vperm.xlu0 %2433, %v1693_v33  }
  0xd3   : > { %2186 = vmatprep.subr.msk.bf16.mxu0 %vm2721_vm12, %v2184_v36  ;;  %vm613_vm3 = vcmp.eq.s32.totalorder %v2703_v8, %v579_v37 }
  0xd4   : > { %2189 = vmatpush3.bf16.xpose.msk.msra.mxu0 %vm2721_vm12, %v2184_v36  ;;  %v1384_v36 = vld [vmem:[%s3095_s8 + $0x8] sm:$0xff] }
  0xd5   : > { %1392 = vperm.xlu1 %2432, %v1384_v36  }
  0xd6   : > { %v741_v12 = vpop.permute.xlu0 %740 }
  0xd7   : > { %v643_v39 = vpop.permute.xlu1 %642 }
  0xd8   : > { %vm677_vm2 = vcmp.eq.s32.totalorder %v2703_v8, %v643_v39 }
  0xd9   : > { %vm693_vm4 = vmor %vm613_vm3, %vm677_vm2  ;;  %vm616_vm2 = vcmp.eq.s32.totalorder %v2703_v8, %v588_v32 }
  0xda   : > { %vm773_vm9 = vmor %vm693_vm4, %vm757_vm5 }
  0xdb   : > { %v646_v41 = vpop.permute.xlu1 %645  ;;  %v1805_v44 = vsel %vm773_vm9, 1.0, %v2505_v14  ;;  %v600_v18 = vpop.permute.xlu0 %599 }
  0xdc   : > { %vm678_vm8 = vcmp.eq.s32.totalorder %v2703_v8, %v646_v41 }
  0xdd   : > { %vm694_vm10 = vmor %vm614_vm6, %vm678_vm8 }
  0xdf   : > { %v606_v34 = vpop.permute.xlu0 %605 }
  0xe0   : > { %v726_v43 = vpop.permute.xlu1 %725 }
  0xe1   : > { %vm758_vm11 = vcmp.eq.s32.totalorder %v2703_v8, %v726_v43 }
  0xe2   : > { %vm774_vm13 = vmor %vm694_vm10, %vm758_vm11 }
  0xe3   : > { %v1806_v45 = vsel %vm774_vm13, 1.0, %v2505_v14  ;;  %vm761_vm13 = vcmp.eq.s32.totalorder %v2703_v8, %v735_v57  ;;  %v821_v57 = vld [vmem:[%s3089_s2 + $0x30] sm:$0xff] }
  0xe4   : > { %v2190_v46 = vpack.c.bf16 %v1806_v45, %v1805_v44  ;;  %v2342_v45 = vunpack.c.l.s8.bf16 %v2641_v4  ;;  %v2344_v4 = vunpack.c.l.s8.bf16 %v2638_v3  ;;  %v827_v3 = vld [vmem:[%s3090_s3 + $0x20] sm:$0xff] }
  0xe5   : > { %v585_v47 = vpop.permute.xlu1 %584 }
  0xe6   : > { %2192 = vmatprep.subr.msk.bf16.mxu0 %vm2721_vm12, %v2190_v46  ;;  %vm615_vm15 = vcmp.eq.s32.totalorder %v2703_v8, %v585_v47  ;;  %v825_v47 = vld [vmem:[%s3090_s3 + $0x10] sm:$0xff] }
  0xe7   : > { %2195 = vmatpush3.bf16.xpose.msk.msra.mxu0 %vm2721_vm12, %v2190_v46  ;;  %v1254_v46 = vld [vmem:[%s3092_s5 + $0x18] sm:$0xff] }
  0xea   : > { %v649_v48 = vpop.permute.xlu1 %648 }
  0xeb   : > { %vm679_vm14 = vcmp.eq.s32.totalorder %v2703_v8, %v649_v48  ;;  %v828_v48 = vld [vmem:[%s3090_s3 + $0x28] sm:$0xff] }
  0xec   : > { %vm695_vm0 = vmor %vm615_vm15, %vm679_vm14  ;;  %vm618_vm15 = vcmp.eq.s32.totalorder %v2703_v8, %v594_v38  ;;  %v747_v38 = vpop.permute.xlu0 %746 }
  0xed   : > { %vm775_vm4 = vmor %vm695_vm0, %vm759_vm1 }
  0xee   : > { %v652_v50 = vpop.permute.xlu1 %651  ;;  %v1807_v52 = vsel %vm775_vm4, 1.0, %v2505_v14 }
  0xef   : > { %vm680_vm3 = vcmp.eq.s32.totalorder %v2703_v8, %v652_v50  ;;  %v829_v50 = vld [vmem:[%s3090_s3 + $0x30] sm:$0xff] }
  0xf0   : > { %vm696_vm5 = vmor %vm616_vm2, %vm680_vm3 }
  0xf3   : > { %v732_v51 = vpop.permute.xlu1 %731 }
  0xf4   : > { %vm760_vm6 = vcmp.eq.s32.totalorder %v2703_v8, %v732_v51  ;;  %v830_v51 = vld [vmem:[%s3090_s3 + $0x38] sm:$0xff] }
  0xf5   : > { %vm776_vm8 = vmor %vm696_vm5, %vm760_vm6 }
  0xf6   : > { %v1808_v53 = vsel %vm776_vm8, 1.0, %v2505_v14  ;;  %vm620_vm8 = vcmp.eq.s32.totalorder %v2703_v8, %v600_v18 }
  0xf7   : > { %v2196_v54 = vpack.c.bf16 %v1808_v53, %v1807_v52  ;;  %v2348_v52 = vunpack.c.l.s8.bf16 %v2657_v22  ;;  %v2350_v53 = vunpack.c.l.s8.bf16 %v2662_v24  ;;  %v2354_v22 = vunpack.c.l.s8.bf16 %v2675_v35  ;;  %v817_v35 = vld [vmem:[%s3089_s2 + $0x10] sm:$0xff] }
  0xf8   : > { %v591_v55 = vpop.permute.xlu1 %590  ;;  %v2356_v24 = vunpack.c.l.s8.bf16 %v2683_v42  ;;  %v818_v42 = vld [vmem:[%s3089_s2 + $0x18] sm:$0xff] }
  0xf9   : > { %2198 = vmatprep.subr.msk.bf16.mxu0 %vm2721_vm12, %v2196_v54  ;;  %vm617_vm10 = vcmp.eq.s32.totalorder %v2703_v8, %v591_v55  ;;  %v819_v55 = vld [vmem:[%s3089_s2 + $0x20] sm:$0xff] }
  0xfa   : > { %2201 = vmatpush3.bf16.xpose.msk.msra.mxu0 %vm2721_vm12, %v2196_v54  ;;  %v2352_v54 = vunpack.c.l.s8.bf16 %v2667_v26  ;;  %v816_v26 = vld [vmem:[%s3089_s2 + $0x8] sm:$0xff] }
  0xfd   : > { %v655_v56 = vpop.permute.xlu1 %654 }
  0xfe   : > { %vm681_vm9 = vcmp.eq.s32.totalorder %v2703_v8, %v655_v56  ;;  %v820_v56 = vld [vmem:[%s3089_s2 + $0x28] sm:$0xff] }
  0xff   : > { %vm697_vm11 = vmor %vm617_vm10, %vm681_vm9  ;;  %vm763_vm10 = vcmp.eq.s32.totalorder %v2703_v8, %v741_v12 }
 0x100   : > { %vm777_vm0 = vmor %vm697_vm11, %vm761_vm13 }
 0x101   : > { %v658_v58 = vpop.permute.xlu1 %657  ;;  %v1809_v63 = vsel %vm777_vm0, 1.0, %v2505_v14 }
 0x102   : > { %vm682_vm14 = vcmp.eq.s32.totalorder %v2703_v8, %v658_v58  ;;  %v822_v58 = vld [vmem:[%s3089_s2 + $0x38] sm:$0xff] }
 0x103   : > { %vm698_vm1 = vmor %vm618_vm15, %vm682_vm14 }
 0x106   : > { %v738_v59 = vpop.permute.xlu1 %737 }
 0x107   : > { %vm762_vm2 = vcmp.eq.s32.totalorder %v2703_v8, %v738_v59  ;;  %v1251_v59 = vld [vmem:[%s3092_s5] sm:$0xff] }
 0x108   : > { %vm778_vm3 = vmor %vm698_vm1, %vm762_vm2 }
 0x109   : > { %v1810_v5 = vsel %vm778_vm3, 1.0, %v2505_v14  ;;  %vm765_vm3 = vcmp.eq.s32.totalorder %v2703_v8, %v747_v38 }
 0x10a   : > { %v2202_v1 = vpack.c.bf16 %v1810_v5, %v1809_v63 }
 0x10b   : > { %v597_v10 = vpop.permute.xlu1 %596 }
 0x10c   : > { %2204 = vmatprep.subr.msk.bf16.mxu0 %vm2721_vm12, %v2202_v1  ;;  %vm619_vm5 = vcmp.eq.s32.totalorder %v2703_v8, %v597_v10 }
 0x10d   : > { %2207 = vmatpush3.bf16.xpose.msk.msra.mxu0 %vm2721_vm12, %v2202_v1 }
 0x110   : > { %v661_v13 = vpop.permute.xlu1 %660 }
 0x111   : > { %vm683_vm4 = vcmp.eq.s32.totalorder %v2703_v8, %v661_v13 }
 0x112   : > { %vm699_vm6 = vmor %vm619_vm5, %vm683_vm4  ;;  %vm622_vm5 = vcmp.eq.s32.totalorder %v2703_v8, %v606_v34 }
 0x113   : > { %vm779_vm11 = vmor %vm699_vm6, %vm763_vm10 }
 0x114   : > { %v664_v19 = vpop.permute.xlu1 %663  ;;  %v1811_v28 = vsel %vm779_vm11, 1.0, %v2505_v14  ;;  %vm1009_vm11 = vcmask 146432  }
 0x115   : > { %vm684_vm9 = vcmp.eq.s32.totalorder %v2703_v8, %v664_v19 }
 0x116   : > { %vm700_vm13 = vmor %vm620_vm8, %vm684_vm9 }
 0x119   : > { %v744_v23 = vpop.permute.xlu1 %743 }
 0x11a   : > { %vm764_vm14 = vcmp.eq.s32.totalorder %v2703_v8, %v744_v23 }
 0x11b   : > { %vm780_vm15 = vmor %vm700_vm13, %vm764_vm14  ;;  %vm2508_vm14 = vmmov 0  }
 0x11c   : > { %v1812_v29 = vsel %vm780_vm15, 1.0, %v2505_v14  ;;  %vm2853_vm13 = vmpackc.low %vm1009_vm11, %vm1009_vm11  ;;  %vm1497_vm15 = vcmask 130048  }
 0x11d   : > { %v2208_v30 = vpack.c.bf16 %v1812_v29, %v1811_v28 }
 0x11e   : > { %v603_v32 = vpop.permute.xlu1 %602 }
 0x11f   : > { %2210 = vmatprep.subr.msk.bf16.mxu0 %vm2721_vm12, %v2208_v30  ;;  %vm621_vm1 = vcmp.eq.s32.totalorder %v2703_v8, %v603_v32 }
 0x120   : > { %2213 = vmatpush3.bf16.xpose.msk.msra.mxu0 %vm2721_vm12, %v2208_v30 }
 0x123   : > { %v667_v37 = vpop.permute.xlu1 %666 }
 0x124   : > { %vm685_vm0 = vcmp.eq.s32.totalorder %v2703_v8, %v667_v37 }
 0x125   : > { %vm701_vm2 = vmor %vm621_vm1, %vm685_vm0  ;;  %vm1571_vm0 = vcmask 80896  }
 0x126   : > { %vm781_vm6 = vmor %vm701_vm2, %vm765_vm3 }
 0x127   : > { %v670_v39 = vpop.permute.xlu1 %669  ;;  %v1813_v41 = vsel %vm781_vm6, 1.0, %v2505_v14  ;;  %vm3001_vm1 = vmpackc.low %vm1571_vm0, %vm1571_vm0 }
 0x128   : > { %vm686_vm4 = vcmp.eq.s32.totalorder %v2703_v8, %v670_v39 }
 0x129   : > { %vm702_vm8 = vmor %vm622_vm5, %vm686_vm4  ;;  %v1203_v62 = vpop.permute.xlu0 %1202 }
 0x12c   : > { %v750_v40 = vpop.permute.xlu1 %749 }
 0x12d   : > { %vm766_vm9 = vcmp.eq.s32.totalorder %v2703_v8, %v750_v40  ;;  %v824_v8 = vld [vmem:[%s3090_s3 + $0x8] sm:$0xff] }
 0x12e   : > { %vm782_vm10 = vmor %vm702_vm8, %vm766_vm9  ;;  %v1218_v19 = vpop.permute.xlu0 %1217 }
 0x12f   : > { %v1814_v43 = vsel %vm782_vm10, 1.0, %v2505_v14 }
 0x130   : > { %v2214_v44 = vpack.c.bf16 %v1814_v43, %v1813_v41 }
 0x131   : > { %v1198_v60 = vpop.permute.xlu1 %1197 }
 0x132   : > { %2216 = vmatprep.subr.msk.bf16.mxu0 %vm2721_vm12, %v2214_v44  ;;  %v1228_v34 = vpop.permute.xlu0 %1227 }
 0x133   : > { %2219 = vmatpush3.bf16.xpose.msk.msra.mxu0 %vm2721_vm12, %v2214_v44  ;;  %v1252_v44 = vld [vmem:[%s3092_s5 + $0x8] sm:$0xff]  ;;  %vm1395_vm12 = vcmask 261120  }
 0x134   : > { %2222 = vmatprep.subr.msk.bf16.mxu0 %vm2853_vm13, %v2342_v45 }
 0x135   : > { %v1208_v61 = vpop.permute.xlu1 %1207 }
 0x139   : > { %v1213_v63 = vpop.permute.xlu1 %1212 }
 0x13a   : > { %2042 = vmatmul.mubr.msk.f32.vlgmr.msra.gmra.mrb[0].mxu0 %vm831_vm7, %v824_v8  ;;  %v1381_v8 = vld [vmem:[%s3094_s7] sm:$0xff] }
 0x13b   : > { %2225 = vmatpush3.bf16.xpose.msk.msra.mxu0 %vm2853_vm13, %v2342_v45  ;;  %2044 = vmatprep.mubr.msk.f32.mxu0 %vm831_vm7, %v825_v47  ;;  %v1253_v45 = vld [vmem:[%s3092_s5 + $0x10] sm:$0xff]  ;;  %v1262_v47 = vpop.permute.xlu0 %1261 }
 0x13c   : > { %2228 = vmatprep.subr.msk.bf16.mxu0 %vm2853_vm13, %v2344_v4 }
 0x13d   : > { %v1223_v15 = vpop.permute.xlu1 %1222 }
 0x13e   : > { %2045 = vmatmul.mubr.msk.f32.gmra.mrb[2].mxu0 %vm831_vm7, %v826_v17 }
 0x13f   : > { %2047 = vmatprep.mubr.msk.f32.mxu0 %vm831_vm7, %v827_v3 }
 0x141   : > { %v1233_v31 = vpop.permute.xlu1 %1232 }
 0x142   : > { %2048 = vmatmul.mubr.msk.f32.gmra.mrb[4].mxu0 %vm831_vm7, %v828_v48 }
 0x143   : > { %2231 = vmatpush3.bf16.xpose.msk.msra.mxu0 %vm2853_vm13, %v2344_v4  ;;  %2050 = vmatprep.mubr.msk.f32.mxu0 %vm831_vm7, %v829_v50 }
 0x144   : > { %2234 = vmatprep.subr.msk.bf16.mxu0 %vm2853_vm13, %v2346_v49 }
 0x145   : > { %v1267_v4 = vpop.permute.xlu1 %1266 }
 0x146   : > { %2051 = vmatmul.mubr.msk.f32.gmra.mrb[6].mxu0 %vm831_vm7, %v830_v51  ;;  %vm1279_vm7 = vcmask 523264  }
 0x147   : > { %2085 = vmatprep.mubr.msk.f32.mxu0 %vm1009_vm11, %v815_v7  ;;  %2113 = vmatprep.mubr.msk.f32.mxu1 %vm1279_vm7, %v1251_v59 }
 0x14b   : > { %2237 = vmatpush3.bf16.xpose.msk.msra.mxu0 %vm2853_vm13, %v2346_v49 }
 0x14c   : > { %2240 = vmatprep.subr.msk.bf16.mxu0 %vm2853_vm13, %v2348_v52 }
 0x14e   : > { %v1277_v51 = vpop.permute.xlu1 %1276 }
 0x153   : > { %2243 = vmatpush3.bf16.xpose.msk.msra.mxu0 %vm2853_vm13, %v2348_v52 }
 0x154   : > { %2246 = vmatprep.subr.msk.bf16.mxu0 %vm2853_vm13, %v2350_v53 }
 0x15b   : > { %2249 = vmatpush3.bf16.xpose.msk.msra.mxu0 %vm2853_vm13, %v2350_v53  ;;  %v1272_v53 = vpop.permute.xlu0 %1271 }
 0x15c   : > { %2252 = vmatprep.subr.msk.bf16.mxu0 %vm2853_vm13, %v2352_v54 }
 0x163   : > { %2255 = vmatpush3.bf16.xpose.msk.msra.mxu0 %vm2853_vm13, %v2352_v54 }
 0x164   : > { %2258 = vmatprep.subr.msk.bf16.mxu0 %vm2853_vm13, %v2354_v22 }
 0x16b   : > { %2261 = vmatpush3.bf16.xpose.msk.msra.mxu0 %vm2853_vm13, %v2354_v22 }
 0x16c   : > { %2264 = vmatprep.subr.msk.bf16.mxu0 %vm2853_vm13, %v2356_v24 }
 0x173   : > { %2267 = vmatpush3.bf16.xpose.msk.msra.mxu0 %vm2853_vm13, %v2356_v24 }
 0x17a   : > { %2086 = vmatmul.mubr.msk.f32.vlgmr.msra.gmra.mrb[0].mxu0 %vm1009_vm11, %v816_v26 }
 0x17b   : > { %2088 = vmatprep.mubr.msk.f32.mxu0 %vm1009_vm11, %v817_v35 }
 0x17e   : > { %2089 = vmatmul.mubr.msk.f32.gmra.mrb[2].mxu0 %vm1009_vm11, %v818_v42 }
 0x17f   : > { %2091 = vmatprep.mubr.msk.f32.mxu0 %vm1009_vm11, %v819_v55 }
 0x182   : > { %2092 = vmatmul.mubr.msk.f32.gmra.mrb[4].mxu0 %vm1009_vm11, %v820_v56  ;;  %v1382_v56 = vld [vmem:[%s3094_s7 + $0x8] sm:$0xff] }
 0x183   : > { %2094 = vmatprep.mubr.msk.f32.mxu0 %vm1009_vm11, %v821_v57  ;;  %v2507_v57 = vmov 0.0|0.0  }
 0x186   : > { %2095 = vmatmul.mubr.msk.f32.gmra.mrb[6].mxu0 %vm1009_vm11, %v822_v58  ;;  %v1393_v58 = vpop.permute.xlu1 %1392 }
 0x24d   : > { %v2087_v5 = vpop.f32.mrb[0].mxu0 }
 0x24e   : > { %v1236_v6 = vadd.f32 %v2087_v5, %v1203_v62  ;;  %v1148_v1 = vpop.f32.mrb[1].mxu0 }
 0x24f   : > { %v1235_v9 = vadd.f32 %v1198_v60, %v1148_v1  ;;  %v1388_v60 = vpop.permute.xlu0 %1387 }
 0x250   : > { %v1244_v10 = vmax.f32 %v1236_v6, 0.0 }
 0x251   : > { %v1243_v11 = vmax.f32 %v1235_v9, 0.0  ;;  %v2090_v2 = vpop.f32.mrb[2].mxu0  ;;  %v1496_v9 = vld [vmem:[%s3097_s10] sm:$0x1] }
 0x252   : > { %v1238_v12 = vadd.f32 %v2090_v2, %v1213_v63  ;;  %v1158_v13 = vpop.f32.mrb[3].mxu0 }
 0x253   : > { %v1237_v16 = vadd.f32 %v1208_v61, %v1158_v13  ;;  %v2268_v18 = vpack.c.bf16 %v1244_v10, %v1243_v11  ;;  %v1479_v10 = vld [vmem:[%s2990_s29] sm:$0xff]  ;;  %v1480_v11 = vld [vmem:[%s2990_s29 + $0x8] sm:$0xff]  ;;  %v1481_v13 = vld [vmem:[%s2990_s29 + $0x10] sm:$0xff] }
 0x254   : > { %v1246_v20 = vmax.f32 %v1238_v12, 0.0  ;;  %v2296_v2 = vpack.c.bf16 %v1480_v11, %v1479_v10 }
 0x255   : > { %v1245_v21 = vmax.f32 %v1237_v16, 0.0  ;;  %v2093_v23 = vpop.f32.mrb[4].mxu0  ;;  %2269 = vmatprep.subr.bf16.mxu1 %v2268_v18 }
 0x256   : > { %v1240_v25 = vadd.f32 %v2093_v23, %v1223_v15  ;;  %v1168_v27 = vpop.f32.mrb[5].mxu0  ;;  %2271 = vmatpush3.bf16.msra.mxu1 %v2268_v18  ;;  %v1482_v15 = vld [vmem:[%s2990_s29 + $0x18] sm:$0xff]  ;;  %v1484_v18 = vld [vmem:[%s2990_s29 + $0x28] sm:$0xff] }
 0x257   : > { %v2272_v28 = vpack.c.bf16 %v1246_v20, %v1245_v21  ;;  %v1239_v29 = vadd.f32 %v1218_v19, %v1168_v27  ;;  %v2300_v16 = vpack.c.bf16 %v1482_v15, %v1481_v13  ;;  %v1485_v20 = vld [vmem:[%s2990_s29 + $0x30] sm:$0xff]  ;;  %v1486_v21 = vld [vmem:[%s2990_s29 + $0x38] sm:$0xff]  ;;  %v1488_v27 = vld [vmem:[%s2990_s29 + $0x48] sm:$0xff] }
 0x258   : > { %v1248_v30 = vmax.f32 %v1240_v25, 0.0  ;;  %v2308_v23 = vpack.c.bf16 %v1486_v21, %v1485_v20  ;;  %v1487_v25 = vld [vmem:[%s2990_s29 + $0x40] sm:$0xff] }
 0x259   : > { %v1247_v32 = vmax.f32 %v1239_v29, 0.0  ;;  %v2096_v33 = vpop.f32.mrb[6].mxu0  ;;  %2273 = vmatprep.subr.bf16.mxu1 %v2272_v28  ;;  %v1489_v29 = vld [vmem:[%s2990_s29 + $0x50] sm:$0xff] }
 0x25a   : > { %v1242_v36 = vadd.f32 %v2096_v33, %v1233_v31  ;;  %v1178_v37 = vpop.f32.mrb[7].mxu0  ;;  %2275 = vmatpush3.bf16.msra.mxu1 %v2272_v28  ;;  %v2312_v28 = vpack.c.bf16 %v1488_v27, %v1487_v25  ;;  %v1492_v33 = vld [vmem:[%s2990_s29 + $0x68] sm:$0xff] }
 0x25b   : > { %v2276_v38 = vpack.c.bf16 %v1248_v30, %v1247_v32  ;;  %v1241_v39 = vadd.f32 %v1228_v34, %v1178_v37  ;;  %v1490_v30 = vld [vmem:[%s2990_s29 + $0x58] sm:$0xff]  ;;  %v1491_v32 = vld [vmem:[%s2990_s29 + $0x60] sm:$0xff] }
 0x25c   : > { %v1250_v40 = vmax.f32 %v1242_v36, 0.0  ;;  %v2316_v31 = vpack.c.bf16 %v1490_v30, %v1489_v29  ;;  %v2320_v34 = vpack.c.bf16 %v1492_v33, %v1491_v32  ;;  %v1493_v36 = vld [vmem:[%s2990_s29 + $0x70] sm:$0xff]  ;;  %v1494_v37 = vld [vmem:[%s2990_s29 + $0x78] sm:$0xff] }
 0x25d   : > { %v1249_v41 = vmax.f32 %v1241_v39, 0.0  ;;  %2277 = vmatprep.subr.bf16.mxu1 %v2276_v38  ;;  %v1495_v39 = vld [vmem:[%s3096_s9] sm:$0x1] }
 0x25e   : > { %2279 = vmatpush3.bf16.msra.mxu1 %v2276_v38  ;;  %v2324_v38 = vpack.c.bf16 %v1494_v37, %v1493_v36 }
 0x25f   : > { %v2280_v43 = vpack.c.bf16 %v1250_v40, %v1249_v41 }
 0x261   : > { %2281 = vmatprep.subr.bf16.mxu1 %v2280_v43 }
 0x262   : > { %2283 = vmatpush3.bf16.msra.mxu1 %v2280_v43  ;;  %v1700_v43 = vshrl.u32 %v525_v0, 7 }
 0x265   : > { %2114 = vmatmul.mubr.msk.f32.vlgmr.msra.gmra.mrb[0].mxu1 %vm1279_vm7, %v1252_v44  ;;  %v1701_v44 = vsub.s32 0, %v1700_v43 }
 0x266   : > { %2116 = vmatprep.mubr.msk.f32.mxu1 %vm1279_vm7, %v1253_v45  ;;  %v1697_v45 = vpop.permute.xlu0 %1696 }
 0x269   : > { %2117 = vmatmul.mubr.msk.f32.gmra.mrb[2].mxu1 %vm1279_vm7, %v1254_v46 }
 0x26a   : > { %2127 = vmatprep.mubr.msk.f32.mxu1 %vm1395_vm12, %v1381_v8  ;;  %v1702_v8 = vrot.slane %v1697_v45, %v1701_v44 }
 0x338   : > { %v2115_v17 = vpop.f32.mrb[0].mxu1 }
 0x339   : > { %v1364_v3 = vadd.f32 %v2115_v17, %v1267_v4  ;;  %v1358_v48 = vpop.f32.mrb[1].mxu1 }
 0x33a   : > { %v1359_v49 = vadd.f32 %v1358_v48, %v1262_v47 }
 0x33b   : > { %v1378_v50 = vmax.f32 %v1364_v3, 0.0 }
 0x33c   : > { %v1377_v7 = vmax.f32 %v1359_v49, 0.0  ;;  %v2118_v52 = vpop.f32.mrb[2].mxu1 }
 0x33d   : > { %v1374_v54 = vadd.f32 %v2118_v52, %v1277_v51  ;;  %v1368_v22 = vpop.f32.mrb[3].mxu1 }
 0x33e   : > { %v2284_v24 = vpack.c.bf16 %v1378_v50, %v1377_v7  ;;  %v1369_v26 = vadd.f32 %v1368_v22, %v1272_v53 }
 0x33f   : > { %v1380_v35 = vmax.f32 %v1374_v54, 0.0 }
 0x340   : > { %v1379_v42 = vmax.f32 %v1369_v26, 0.0  ;;  %2285 = vmatprep.subr.bf16.mxu1 %v2284_v24 }
 0x341   : > { %2287 = vmatpush3.bf16.msra.mxu1 %v2284_v24 }
 0x342   : > { %v2288_v55 = vpack.c.bf16 %v1380_v35, %v1379_v42 }
 0x344   : > { %2289 = vmatprep.subr.bf16.mxu1 %v2288_v55 }
 0x345   : > { %2291 = vmatpush3.bf16.msra.mxu1 %v2288_v55 }
 0x346   : > { %2292 = vmatprep.subr.bf16.mxu1 %v2507_v57 }
 0x348   : > { %2128 = vmatmul.mubr.msk.f32.vlgmr.msra.gmra.mrb[4].mxu1 %vm1395_vm12, %v1382_v56 }
 0x349   : > { %2134 = vmatprep.mubr.msk.f32.mxu1 %vm2508_vm14, %v2505_v14 }
 0x41b   : > { %v2129_v59 = vpop.f32.mrb[4].mxu1 }
 0x41c   : > { %v1474_v61 = vadd.f32 %v2129_v59, %v1393_v58  ;;  %v1468_v62 = vpop.f32.mrb[5].mxu1 }
 0x41d   : > { %v1469_v63 = vadd.f32 %v1468_v62, %v1388_v60 }
 0x41e   : > { %v1478_v5 = vmax.f32 %v1474_v61, 0.0 }
 0x41f   : > { %v1477_v6 = vmax.f32 %v1469_v63, 0.0 }
 0x421   : > { %v2293_v1 = vpack.c.bf16 %v1478_v5, %v1477_v6 }
 0x423   : > { %2294 = vmatpush3.bf16.msra.mxu1 %v2293_v1 }
 0x424   : > { %2295 = vmatprep.subr.bf16.mxu1 %v2507_v57 }
 0x426   : > { %2135 = vmatmul.mubr.msk.f32.vlgmr.msra.gmra.mrb[6].mxu1 %vm1497_vm15, %v1496_v9 }
 0x427   : > { %2169 = vmatprep.mubr.msk.f32.mxu1 %vm2508_vm14, %v2505_v14  ;;  %v1483_v14 = vld [vmem:[%s2990_s29 + $0x20] sm:$0xff]  ;;  %s3045_s29 = scalar_lea.hbm %s3099_s12, %s2623_s16 }
 0x428   : > { %v2304_v19 = vpack.c.bf16 %v1484_v18, %v1483_v14 }
 0x42c   : > { %2298 = vmatpush3.bf16.xpose.msk.msra.mxu1 %vm3001_vm1, %v2296_v2 }
 0x42d   : > { %2299 = vmatprep.subr.bf16.mxu1 %v2507_v57 }
 0x434   : > { %2302 = vmatpush3.bf16.xpose.msk.msra.mxu1 %vm3001_vm1, %v2300_v16 }
 0x435   : > { %2303 = vmatprep.subr.bf16.mxu1 %v2507_v57 }
 0x43c   : > { %2306 = vmatpush3.bf16.xpose.msk.msra.mxu1 %vm3001_vm1, %v2304_v19 }
 0x43d   : > { %2307 = vmatprep.subr.bf16.mxu1 %v2507_v57 }
 0x444   : > { %2310 = vmatpush3.bf16.xpose.msk.msra.mxu1 %vm3001_vm1, %v2308_v23 }
 0x445   : > { %2311 = vmatprep.subr.bf16.mxu1 %v2507_v57 }
 0x44c   : > { %2314 = vmatpush3.bf16.xpose.msk.msra.mxu1 %vm3001_vm1, %v2312_v28 }
 0x44d   : > { %2315 = vmatprep.subr.bf16.mxu1 %v2507_v57 }
 0x454   : > { %2318 = vmatpush3.bf16.xpose.msk.msra.mxu1 %vm3001_vm1, %v2316_v31 }
 0x455   : > { %2319 = vmatprep.subr.bf16.mxu1 %v2507_v57 }
 0x45c   : > { %2322 = vmatpush3.bf16.xpose.msk.msra.mxu1 %vm3001_vm1, %v2320_v34 }
 0x45d   : > { %2323 = vmatprep.subr.bf16.mxu1 %v2507_v57 }
 0x464   : > { %2326 = vmatpush3.bf16.xpose.msk.msra.mxu1 %vm3001_vm1, %v2324_v38 }
 0x46b   : > { %2170 = vmatmul.mubr.msk.f32.vlgmr.msra.gmra.mrb[8].mxu1 %vm1571_vm0, %v1495_v39 }
 0x4f9   : > { %v1567_v40 = vpop.f32.mrb[6].mxu1 }
 0x4fa   : > { %v2136_v41 = vpop.f32.mrb[7].mxu1 }
 0x53e   : > { %v1689_v46 = vpop.f32.mrb[8].mxu1 }
 0x53f   : > { %v1690_v4 = vadd.f32 %v1689_v46, %v1567_v40  ;;  %v2171_v47 = vpop.f32.mrb[9].mxu1 }
 0x541   : > { %v1703_v17 = vadd.f32 %v1702_v8, %v1690_v4 }
 0x543   : > { %v1887_v3 = vmul.f32 -1.442695, %v1703_v17 }
 0x545   : > { %2434 = vpow2.f32 %v1887_v3 }
 0x54f   : > { %v2435_v48 = vpop.eup %2434 }
 0x550   : > { %v1707_v49 = vadd.f32 1.0, %v2435_v48 }
 0x552   : > { %2436 = vrcp.f32 %v1707_v49 }
 0x55c   : > { %v2437_v0 = vpop.eup %2436 }
 0x55d   : > { %1710 = vst [vmem:[%s448_s21] sm:$0x1] %v2437_v0 }
 0x55e   : > { %2451 = shalt.err (!%p2448_p3)
}
 0x55f   : > { %s2452_s16 = scalar_lea.hbm %s3045_s29, 16  ;;  %s2456_s11 = scalar_lea.hbm %s3099_s12, 32 }
 0x560   : > { %p2453_p4 = scmp.ne.s32.totalorder %s3045_s29, %s2452_s16  ;;  %p2457_p9 = scmp.lt.u32.totalorder %s3045_s29, %s3099_s12 }
 0x561   : > { %p2458_p10 = scmp.lt.u32.totalorder %s2456_s11, %s2452_s16  ;;  %p2460_p12 = scmp.lt.u32.totalorder %s2452_s16, %s3045_s29 }
 0x562   : > { %p2454_p7 = pnand %p2453_p4, %p2613_p5 }
 0x563   : > { %p2459_p11 = por %p2458_p10, %p2457_p9 }
 0x564   : > { %p2455_p8 = pneg %p2454_p7 }
 0x565   : > { %p2461_p13 = por %p2460_p12, %p2459_p11 }
 0x567   : > { %p2462_p0 = pnand %p2461_p13, %p2455_p8 }
 0x569   : > { %2465 = shalt.err (!%p2462_p0)
}
 0x56a   : > { %2358 = dma.vmem_to_hbm [thread:$0]  (%p2613_p5), %s3047_s22, 16, %s3045_s29, %s1712_s30  }
 0x56b PF: > { %p2364_p1 = scmp.ge.s32.totalorder %s2500_s26, 2  ;;  %s1736_s0 = sand.u32 1, %s2488_s23  }
 0x56c   : > { %s1737_s18 = scalar_lea.sflag [#allocation4], %s1736_s0 }
 0x56d   : > { %p2361_p2 = pnand %p2364_p1, %p2617_p6 }
 0x56f   : > { %2483 = dma.done.wait (!%p2361_p2), %s1737_s18, 16  }
 0x570   : > { %2485 = vsyncadd (!%p2361_p2), %s1737_s18, 4294967280  ;;  %p24_p3 = scmp.ge.s32.totalorder %s2601_s28, 4   ;;  %s3110_s23 = smov %s2492_s24 }
 0x571   : > { %s3111_s24 = smov %s2496_s25  ;;  %s3112_s25 = smov %s2611_s13 }
 0x572   : > { %s3113_s26 = smov %s2601_s28  ;;  %26 = sbr.rel (!%p24_p3) target bundleno = 6 (0x6), region = 106 }
 0x579   :  { %1741 = vsyncpa [#allocation4], 1 }
 0x57a   :  { %1743 = vsyncpa [#allocation4 + $0x1], 1 }

</bundles_post_ra>
